<compile_context>
chip_gen: v7x
topology: tpu7x:2x2x1
jax: 0.10.0
libtpu: 0.0.40
codegen_flags: <defaults>
</compile_context>

<pallas_src>
import functools

import numpy as np
import jax
import jax.numpy as jnp
from jax.experimental import pallas as pl
from jax.experimental.pallas import tpu as pltpu


# ----------------------------- Pallas kernels --------------------------------

def _upsample_kernel(x_ref, w_ref, b_ref, o_ref):
    """One ConvTranspose2d(1,1,(3,KW),stride=(1,s)) stage + LeakyReLU(0.4).

    x_ref: (1, H+2, Wp) zero-stuffed & padded input slab (one batch element)
    w_ref: (3, KW)      spatially flipped kernel (SMEM, scalar reads)
    b_ref: (1,)         bias (SMEM)
    o_ref: (1, H, Wout)
    """
    H = o_ref.shape[1]
    Wout = o_ref.shape[2]
    KW = w_ref.shape[1]
    acc = jnp.zeros((H, Wout), jnp.float32)
    for kh in range(3):
        for kw in range(KW):
            acc = acc + w_ref[kh, kw] * x_ref[0, kh:kh + H, kw:kw + Wout]
    acc = acc + b_ref[0]
    o_ref[0] = jnp.where(acc >= 0.0, acc, 0.4 * acc)


def _wavenet_kernel(x_ref, c_ref, wfr_ref, bfr_ref,
                    wfg_ref, bfg_ref, wc_ref, wrs_ref, brs_ref,
                    w1_ref, b1_ref, w2_ref, b2_ref,
                    o_ref, h_buf, *, dils):
    """Fused WaveNet: causal front conv -> L residual layers -> final convs.

    x_ref  : (1, T+31, 1)    causally left-padded input (time-major column)
    c_ref  : (1, T, cin)     upsampled conditioning (time-major)
    wfr/bfr: (32, R)/(1, R)  front conv weights
    wfg    : (L, 2R, 2G)     packed [wf_dilated; wf_current | gate...]
    bfg    : (L, 1, 2G)      packed (bf+bfc | bg+bgc)
    wc     : (cin, L*2G)     conditioning projections of ALL layers, packed
    wrs    : (L, G, R+S)     packed [wr | ws];  brs: (L, 1, R+S)
    w1/b1/w2/b2              final 1x1 convs
    o_ref  : (1, T, O)
    h_buf  : VMEM scratch (P+T, R); first P rows stay zero (causal prefix).
    """
    T = o_ref.shape[1]
    R = wfr_ref.shape[1]
    K_front = wfr_ref.shape[0]
    G2 = bfg_ref.shape[2]                                 # 2 * gate_channels
    G = G2 // 2
    S = w1_ref.shape[0]
    P = h_buf.shape[0] - T

    # Reset the zero causal prefix (scratch persists across grid steps).
    h_buf[0:P, :] = jnp.zeros((P, R), jnp.float32)

    # ---- causal front conv (1 -> R, 32 taps): windows built in VMEM ---------
    xc = x_ref[0]                                         # (T + 31, 1)
    acc = jnp.zeros((T, R), jnp.float32)
    for k in range(K_front):                              # shifted-read MAC
        acc = acc + xc[k:k + T, :] * wfr_ref[k:k + 1, :]
    h_buf[P:P + T, :] = jnp.maximum(acc + bfr_ref[...], 0.0)

    # ---- conditioning projections for ALL layers: ONE wide MXU matmul -------
    cc = c_ref[0]                                         # (T, cin)
    cond_all = jnp.dot(cc, wc_ref[...],
                       preferred_element_type=jnp.float32)  # (T, L*2G)

    skip = jnp.zeros((T, S), jnp.float32)
    scale = np.float32(np.sqrt(0.5))

    # ---- fused residual stack: h & skip stay resident in VMEM ---------------
    for l, d in enumerate(dils):
        h = h_buf[P:P + T, :]                             # current samples
        hm = h_buf[P - d:P - d + T, :]                    # delayed by d (zeros before t=0)
        fg = (jnp.dot(hm, wfg_ref[l, 0:R, :], preferred_element_type=jnp.float32)
              + jnp.dot(h, wfg_ref[l, R:2 * R, :], preferred_element_type=jnp.float32)
              + cond_all[:, l * G2:(l + 1) * G2]
              + bfg_ref[l])                               # (T, 2G) = [filter | gate]
        z = jnp.tanh(fg[:, :G]) * jax.nn.sigmoid(fg[:, G:])
        rs = jnp.dot(z, wrs_ref[l], preferred_element_type=jnp.float32) + brs_ref[l]
        h_buf[P:P + T, :] = (h + rs[:, :R]) * scale       # residual update
        skip = skip + rs[:, R:]                           # skip accumulation

    # ---- final conv: ReLU -> 1x1 -> ReLU -> 1x1 (skip never hits HBM) -------
    s0 = jnp.maximum(skip, 0.0)
    s1 = jnp.maximum(jnp.dot(s0, w1_ref[...], preferred_element_type=jnp.float32)
                     + b1_ref[...], 0.0)
    o_ref[0] = (jnp.dot(s1, w2_ref[...], preferred_element_type=jnp.float32)
                + b2_ref[...])


# ------------------------------ wrappers --------------------------------------

def upsample_stage(c3, wt, bt, s):
    """ConvTranspose2d(1,1,(3,2s),stride=(1,s),padding=(1,s//2)) + LeakyReLU(0.4).
    c3: (B, H, W) -> (B, H, W*s).  Zero stuffing / padding is JAX glue; the
    multiply-accumulate + LeakyReLU runs in the Pallas kernel."""
    B, H, W = c3.shape
    KW = 2 * s
    if s > 1:
        cd = jnp.zeros((B, H, (W - 1) * s + 1), c3.dtype).at[:, :, ::s].set(c3)
    else:
        cd = c3
    pad_h = 3 - 1 - 1                 # kh - 1 - padding_h
    pad_w = KW - 1 - s // 2           # kw - 1 - padding_w
    cp = jnp.pad(cd, ((0, 0), (pad_h, pad_h), (pad_w, pad_w)))
    Hp, Wp = cp.shape[1], cp.shape[2]
    Wout = (W - 1) * s - 2 * (s // 2) + KW
    wflip = wt[::-1, ::-1]            # transposed conv == corr with flipped kernel
    return pl.pallas_call(
        _upsample_kernel,
        out_shape=jax.ShapeDtypeStruct((B, H, Wout), jnp.float32),
        grid=(B,),
        in_specs=[
            pl.BlockSpec((1, Hp, Wp), lambda b: (b, 0, 0)),
            pl.BlockSpec(memory_space=pltpu.MemorySpace.SMEM),
            pl.BlockSpec(memory_space=pltpu.MemorySpace.SMEM),
        ],
        out_specs=pl.BlockSpec((1, H, Wout), lambda b: (b, 0, 0)),
        compiler_params=pltpu.CompilerParams(dimension_semantics=("parallel",)),
    )(cp, wflip, bt)


def pack_params(params, cfg):
    """Stack per-layer ResBlock weights along a leading layer axis, merge the
    filter/gate and res/skip projections into wide matrices, and pack ALL
    layers' conditioning projections into one (cin, L*2G) matrix."""
    wfg, bfg, wrs, brs, wc = [], [], [], [], []
    for p in params['res']:
        wf_full = jnp.concatenate([p['wf'][0], p['wf'][1]], axis=0)       # (2R, G)
        wg_full = jnp.concatenate([p['wg'][0], p['wg'][1]], axis=0)       # (2R, G)
        wfg.append(jnp.concatenate([wf_full, wg_full], axis=1))           # (2R, 2G)
        bfg.append(jnp.concatenate([p['bf'] + p['bfc'],
                                    p['bg'] + p['bgc']], axis=1))         # (1, 2G)
        wc.append(jnp.concatenate([p['wfc'], p['wgc']], axis=1))          # (cin, 2G)
        wrs.append(jnp.concatenate([p['wr'], p['ws']], axis=1))           # (G, R+S)
        brs.append(jnp.concatenate([p['br'], p['bs']], axis=1))           # (1, R+S)
    return dict(wfg=jnp.stack(wfg), bfg=jnp.stack(bfg),
                wc=jnp.concatenate(wc, axis=1),                           # (cin, L*2G)
                wrs=jnp.stack(wrs), brs=jnp.stack(brs))


def wavenet_stack(xpad, c_t, wfr, bfr, packed, final, dils, cfg):
    """Single fused pallas_call for front conv + residual stack + final convs."""
    B, T, cin = c_t.shape
    R, G, S, O = cfg['R'], cfg['G'], cfg['S'], cfg['O']
    L = packed['wfg'].shape[0]
    K_front = wfr.shape[0]
    w1, b1, w2, b2 = final
    P = ((max(dils) + 7) // 8) * 8            # zero causal prefix, sublane aligned
    kernel = functools.partial(_wavenet_kernel, dils=tuple(dils))
    return pl.pallas_call(
        kernel,
        out_shape=jax.ShapeDtypeStruct((B, T, O), jnp.float32),
        grid=(B,),
        in_specs=[
            pl.BlockSpec((1, T + K_front - 1, 1), lambda b: (b, 0, 0)),
            pl.BlockSpec((1, T, cin), lambda b: (b, 0, 0)),
            pl.BlockSpec((K_front, R), lambda b: (0, 0)),
            pl.BlockSpec((1, R), lambda b: (0, 0)),
            pl.BlockSpec((L, 2 * R, 2 * G), lambda b: (0, 0, 0)),
            pl.BlockSpec((L, 1, 2 * G), lambda b: (0, 0, 0)),
            pl.BlockSpec((cin, L * 2 * G), lambda b: (0, 0)),
            pl.BlockSpec((L, G, R + S), lambda b: (0, 0, 0)),
            pl.BlockSpec((L, 1, R + S), lambda b: (0, 0, 0)),
            pl.BlockSpec((S, S), lambda b: (0, 0)),
            pl.BlockSpec((1, S), lambda b: (0, 0)),
            pl.BlockSpec((S, O), lambda b: (0, 0)),
            pl.BlockSpec((1, O), lambda b: (0, 0)),
        ],
        out_specs=pl.BlockSpec((1, T, O), lambda b: (b, 0, 0)),
        scratch_shapes=[pltpu.VMEM((P + T, R), jnp.float32)],
        compiler_params=pltpu.CompilerParams(
            dimension_semantics=("parallel",),
            vmem_limit_bytes=32 * 1024 * 1024),
    )(xpad, c_t, wfr, bfr,
      packed['wfg'], packed['bfg'], packed['wc'], packed['wrs'], packed['brs'],
      w1, b1, w2, b2)


def wavenet_forward(params, x, c, cfg):
    """Full Wavenet.forward: upsample conditioning, then one fused kernel for
    front conv + residual stack + final conv.  x:(B,1,T), c:(B,cin,Tc) -> (B,O,T)."""
    B, _, T = x.shape

    # conditioning upsample (ConvTranspose2d stack + LeakyReLU(0.4))
    cu = c
    for (wt, bt), s in zip(params['upsample'], cfg['scales']):
        cu = upsample_stage(cu, wt, bt, s)
    assert cu.shape[2] == T, "upsampled conditioning length must match x"
    c_t = jnp.transpose(cu, (0, 2, 1))                     # (B, T, cin)

    K_front = params['front'][0].shape[0]
    xpad = jnp.pad(x[:, 0, :], ((0, 0), (K_front - 1, 0)))[:, :, None]  # (B, T+31, 1)

    dils = [cfg['K'] ** n
            for _ in range(cfg['num_blocks']) for n in range(cfg['num_layers'])]
    packed = pack_params(params, cfg)

    out = wavenet_stack(xpad, c_t, params['front'][0], params['front'][1],
                        packed, params['final'], dils, cfg)   # (B, T, O)
    return jnp.transpose(out, (0, 2, 1))                      # (B, O, T)


# ----------------------- deterministic parameter init -------------------------

def init_params(key, cfg):
    keys = iter(jax.random.split(key, 256))

    def kaiming(shape, fan_in):
        return jax.random.normal(next(keys), shape, jnp.float32) * np.sqrt(2.0 / fan_in)

    def bias(shape):
        return jax.random.uniform(next(keys), shape, jnp.float32, -0.05, 0.05)

    R, G, S, cin, O = cfg['R'], cfg['G'], cfg['S'], cfg['cin'], cfg['O']
    params = {}
    params['upsample'] = [(kaiming((3, 2 * s), 3 * 2 * s), bias((1,)))
                          for s in cfg['scales']]
    params['front'] = (kaiming((32, R), 32), bias((1, R)))
    params['res'] = []
    for _ in range(cfg['num_blocks'] * cfg['num_layers']):
        params['res'].append(dict(
            wf=kaiming((2, R, G), 2 * R), bf=bias((1, G)),
            wg=kaiming((2, R, G), 2 * R), bg=bias((1, G)),
            wfc=kaiming((cin, G), cin), bfc=bias((1, G)),
            wgc=kaiming((cin, G), cin), bgc=bias((1, G)),
            wr=kaiming((G, R), G), br=bias((1, R)),
            ws=kaiming((G, S), G), bs=bias((1, S)),
        ))
    params['final'] = (kaiming((S, S), S), bias((1, S)),
                       kaiming((S, O), S), bias((1, O)))
    return params


# ----------------------- pure-JAX reference (lax convs) ------------------------

def reference_forward(params, x, c, cfg):
    HIGH = jax.lax.Precision.HIGHEST
    T = x.shape[2]

    cu = c[:, None]                                    # (B,1,cin,Tc)
    for (wt, bt), s in zip(params['upsample'], cfg['scales']):
        KW = 2 * s
        wflip = wt[::-1, ::-1].reshape(1, 1, 3, KW)
        pad_w = KW - 1 - s // 2
        y = jax.lax.conv_general_dilated(
            cu, wflip, window_strides=(1, 1),
            padding=[(1, 1), (pad_w, pad_w)], lhs_dilation=(1, s),
            dimension_numbers=('NCHW', 'OIHW', 'NCHW'), precision=HIGH) + bt[0]
        cu = jnp.where(y >= 0, y, 0.4 * y)
    c_up = cu[:, 0]                                    # (B,cin,T)

    wfr, bfr = params['front']
    w3 = jnp.transpose(wfr, (1, 0))[:, None, :]        # (R,1,32)
    h = jax.lax.conv_general_dilated(
        x, w3, window_strides=(1,), padding=[(31, 31)],
        dimension_numbers=('NCH', 'OIH', 'NCH'), precision=HIGH)[:, :, :T]
    h = jnp.maximum(h + bfr.reshape(1, -1, 1), 0.0)

    skip = 0.0
    dils = [cfg['K'] ** n
            for _ in range(cfg['num_blocks']) for n in range(cfg['num_layers'])]
    for p, d in zip(params['res'], dils):
        def dilconv(inp, w2rg, b):
            wt = jnp.transpose(w2rg, (2, 1, 0))        # (G,R,2)
            y = jax.lax.conv_general_dilated(
                inp, wt, window_strides=(1,), padding=[(d, d)],
                rhs_dilation=(d,), dimension_numbers=('NCH', 'OIH', 'NCH'),
                precision=HIGH)[:, :, :T]
            return y + b.reshape(1, -1, 1)
        hf = (dilconv(h, p['wf'], p['bf'])
              + jnp.einsum('bct,cg->bgt', c_up, p['wfc'], precision=HIGH)
              + p['bfc'].reshape(1, -1, 1))
        hg = (dilconv(h, p['wg'], p['bg'])
              + jnp.einsum('bct,cg->bgt', c_up, p['wgc'], precision=HIGH)
              + p['bgc'].reshape(1, -1, 1))
        z = jnp.tanh(hf) * jax.nn.sigmoid(hg)
        res = jnp.einsum('bgt,gr->brt', z, p['wr'], precision=HIGH) + p['br'].reshape(1, -1, 1)
        sk = jnp.einsum('bgt,gs->bst', z, p['ws'], precision=HIGH) + p['bs'].reshape(1, -1, 1)
        h = (h + res) * np.sqrt(0.5)
        skip = skip + sk

    w1, b1, w2, b2 = params['final']
    o = jnp.maximum(skip, 0.0)
    o = jnp.einsum('bst,so->bot', o, w1, precision=HIGH) + b1.reshape(1, -1, 1)
    o = jnp.maximum(o, 0.0)
    o = jnp.einsum('bst,so->bot', o, w2, precision=HIGH) + b2.reshape(1, -1, 1)
    return o


# ------------------------------------ main -------------------------------------

if __name__ == "__main__":
    cfg = dict(O=2, num_blocks=2, num_layers=3, R=32, G=32, S=32, K=2,
               cin=16, scales=(2, 2))
    B, Tc = 2, 4
    T = Tc
    for s in cfg['scales']:
        T *= s                                          # 16

    key = jax.random.PRNGKey(0)
    kx, kc, kp = jax.random.split(key, 3)
    x = jax.random.normal(kx, (B, 1, T), jnp.float32)
    c = jax.random.normal(kc, (B, cfg['cin'], Tc), jnp.float32)
    params = init_params(kp, cfg)

    out = wavenet_forward(params, x, c, cfg)
    out = jax.block_until_ready(out)

    ref = reference_forward(params, x, c, cfg)
    np.testing.assert_allclose(np.asarray(out), np.asarray(ref),
                               rtol=5e-2, atol=5e-2)
    print("KERNEL_OK")
</pallas_src>

<mosaic_0001>
module attributes {stable_mosaic.version = 11 : i64} {
  func.func @_upsample_kernel(%arg0: i32, %arg1: memref<1x18x11xf32, #tpu.memory_space<vmem>>, %arg2: memref<3x4xf32, #tpu.memory_space<smem>>, %arg3: memref<1xf32, #tpu.memory_space<smem>>, %arg4: memref<1x16x8xf32, #tpu.memory_space<vmem>>) attributes {dimension_semantics = [#tpu.dimension_semantics<parallel>], iteration_bounds = array<i64: 2>, scalar_prefetch = 0 : i64, scratch_operands = 0 : i64, tpu.core_type = #tpu.core_type<tc>, window_params = [{transform_indices = @transform_0, window_bounds = array<i64: 1, 18, 11>}, {transform_indices = @transform_1, window_bounds = array<i64: 3, 4>}, {transform_indices = @transform_2, window_bounds = array<i64: 1>}, {transform_indices = @transform_3, window_bounds = array<i64: 1, 16, 8>}]} {
    %cst = arith.constant 0.000000e+00 : f32
    %0 = vector.broadcast %cst : f32 to vector<16x8xf32>
    %c0 = arith.constant 0 : index
    %c0_0 = arith.constant 0 : index
    %1 = memref.load %arg2[%c0, %c0_0] : memref<3x4xf32, #tpu.memory_space<smem>>
    %c0_1 = arith.constant 0 : index
    %c0_2 = arith.constant 0 : index
    %c0_3 = arith.constant 0 : index
    %2 = vector.load %arg1[%c0_1, %c0_2, %c0_3] : memref<1x18x11xf32, #tpu.memory_space<vmem>>, vector<1x16x8xf32>
    %3 = vector.shape_cast %2 : vector<1x16x8xf32> to vector<16x8xf32>
    %4 = vector.broadcast %1 : f32 to vector<16x8xf32>
    %5 = arith.mulf %4, %3 : vector<16x8xf32>
    %6 = arith.addf %0, %5 : vector<16x8xf32>
    %c0_4 = arith.constant 0 : index
    %c1 = arith.constant 1 : index
    %7 = memref.load %arg2[%c0_4, %c1] : memref<3x4xf32, #tpu.memory_space<smem>>
    %c0_5 = arith.constant 0 : index
    %c0_6 = arith.constant 0 : index
    %c1_7 = arith.constant 1 : index
    %8 = vector.load %arg1[%c0_5, %c0_6, %c1_7] : memref<1x18x11xf32, #tpu.memory_space<vmem>>, vector<1x16x8xf32>
    %9 = vector.shape_cast %8 : vector<1x16x8xf32> to vector<16x8xf32>
    %10 = vector.broadcast %7 : f32 to vector<16x8xf32>
    %11 = arith.mulf %10, %9 : vector<16x8xf32>
    %12 = arith.addf %6, %11 : vector<16x8xf32>
    %c0_8 = arith.constant 0 : index
    %c2 = arith.constant 2 : index
    %13 = memref.load %arg2[%c0_8, %c2] : memref<3x4xf32, #tpu.memory_space<smem>>
    %c0_9 = arith.constant 0 : index
    %c0_10 = arith.constant 0 : index
    %c2_11 = arith.constant 2 : index
    %14 = vector.load %arg1[%c0_9, %c0_10, %c2_11] : memref<1x18x11xf32, #tpu.memory_space<vmem>>, vector<1x16x8xf32>
    %15 = vector.shape_cast %14 : vector<1x16x8xf32> to vector<16x8xf32>
    %16 = vector.broadcast %13 : f32 to vector<16x8xf32>
    %17 = arith.mulf %16, %15 : vector<16x8xf32>
    %18 = arith.addf %12, %17 : vector<16x8xf32>
    %c0_12 = arith.constant 0 : index
    %c3 = arith.constant 3 : index
    %19 = memref.load %arg2[%c0_12, %c3] : memref<3x4xf32, #tpu.memory_space<smem>>
    %c0_13 = arith.constant 0 : index
    %c0_14 = arith.constant 0 : index
    %c3_15 = arith.constant 3 : index
    %20 = vector.load %arg1[%c0_13, %c0_14, %c3_15] : memref<1x18x11xf32, #tpu.memory_space<vmem>>, vector<1x16x8xf32>
    %21 = vector.shape_cast %20 : vector<1x16x8xf32> to vector<16x8xf32>
    %22 = vector.broadcast %19 : f32 to vector<16x8xf32>
    %23 = arith.mulf %22, %21 : vector<16x8xf32>
    %24 = arith.addf %18, %23 : vector<16x8xf32>
    %c1_16 = arith.constant 1 : index
    %c0_17 = arith.constant 0 : index
    %25 = memref.load %arg2[%c1_16, %c0_17] : memref<3x4xf32, #tpu.memory_space<smem>>
    %c0_18 = arith.constant 0 : index
    %c1_19 = arith.constant 1 : index
    %c0_20 = arith.constant 0 : index
    %26 = vector.load %arg1[%c0_18, %c1_19, %c0_20] : memref<1x18x11xf32, #tpu.memory_space<vmem>>, vector<1x16x8xf32>
    %27 = vector.shape_cast %26 : vector<1x16x8xf32> to vector<16x8xf32>
    %28 = vector.broadcast %25 : f32 to vector<16x8xf32>
    %29 = arith.mulf %28, %27 : vector<16x8xf32>
    %30 = arith.addf %24, %29 : vector<16x8xf32>
    %c1_21 = arith.constant 1 : index
    %c1_22 = arith.constant 1 : index
    %31 = memref.load %arg2[%c1_21, %c1_22] : memref<3x4xf32, #tpu.memory_space<smem>>
    %c0_23 = arith.constant 0 : index
    %c1_24 = arith.constant 1 : index
    %c1_25 = arith.constant 1 : index
    %32 = vector.load %arg1[%c0_23, %c1_24, %c1_25] : memref<1x18x11xf32, #tpu.memory_space<vmem>>, vector<1x16x8xf32>
    %33 = vector.shape_cast %32 : vector<1x16x8xf32> to vector<16x8xf32>
    %34 = vector.broadcast %31 : f32 to vector<16x8xf32>
    %35 = arith.mulf %34, %33 : vector<16x8xf32>
    %36 = arith.addf %30, %35 : vector<16x8xf32>
    %c1_26 = arith.constant 1 : index
    %c2_27 = arith.constant 2 : index
    %37 = memref.load %arg2[%c1_26, %c2_27] : memref<3x4xf32, #tpu.memory_space<smem>>
    %c0_28 = arith.constant 0 : index
    %c1_29 = arith.constant 1 : index
    %c2_30 = arith.constant 2 : index
    %38 = vector.load %arg1[%c0_28, %c1_29, %c2_30] : memref<1x18x11xf32, #tpu.memory_space<vmem>>, vector<1x16x8xf32>
    %39 = vector.shape_cast %38 : vector<1x16x8xf32> to vector<16x8xf32>
    %40 = vector.broadcast %37 : f32 to vector<16x8xf32>
    %41 = arith.mulf %40, %39 : vector<16x8xf32>
    %42 = arith.addf %36, %41 : vector<16x8xf32>
    %c1_31 = arith.constant 1 : index
    %c3_32 = arith.constant 3 : index
    %43 = memref.load %arg2[%c1_31, %c3_32] : memref<3x4xf32, #tpu.memory_space<smem>>
    %c0_33 = arith.constant 0 : index
    %c1_34 = arith.constant 1 : index
    %c3_35 = arith.constant 3 : index
    %44 = vector.load %arg1[%c0_33, %c1_34, %c3_35] : memref<1x18x11xf32, #tpu.memory_space<vmem>>, vector<1x16x8xf32>
    %45 = vector.shape_cast %44 : vector<1x16x8xf32> to vector<16x8xf32>
    %46 = vector.broadcast %43 : f32 to vector<16x8xf32>
    %47 = arith.mulf %46, %45 : vector<16x8xf32>
    %48 = arith.addf %42, %47 : vector<16x8xf32>
    %c2_36 = arith.constant 2 : index
    %c0_37 = arith.constant 0 : index
    %49 = memref.load %arg2[%c2_36, %c0_37] : memref<3x4xf32, #tpu.memory_space<smem>>
    %c0_38 = arith.constant 0 : index
    %c2_39 = arith.constant 2 : index
    %c0_40 = arith.constant 0 : index
    %50 = vector.load %arg1[%c0_38, %c2_39, %c0_40] : memref<1x18x11xf32, #tpu.memory_space<vmem>>, vector<1x16x8xf32>
    %51 = vector.shape_cast %50 : vector<1x16x8xf32> to vector<16x8xf32>
    %52 = vector.broadcast %49 : f32 to vector<16x8xf32>
    %53 = arith.mulf %52, %51 : vector<16x8xf32>
    %54 = arith.addf %48, %53 : vector<16x8xf32>
    %c2_41 = arith.constant 2 : index
    %c1_42 = arith.constant 1 : index
    %55 = memref.load %arg2[%c2_41, %c1_42] : memref<3x4xf32, #tpu.memory_space<smem>>
    %c0_43 = arith.constant 0 : index
    %c2_44 = arith.constant 2 : index
    %c1_45 = arith.constant 1 : index
    %56 = vector.load %arg1[%c0_43, %c2_44, %c1_45] : memref<1x18x11xf32, #tpu.memory_space<vmem>>, vector<1x16x8xf32>
    %57 = vector.shape_cast %56 : vector<1x16x8xf32> to vector<16x8xf32>
    %58 = vector.broadcast %55 : f32 to vector<16x8xf32>
    %59 = arith.mulf %58, %57 : vector<16x8xf32>
    %60 = arith.addf %54, %59 : vector<16x8xf32>
    %c2_46 = arith.constant 2 : index
    %c2_47 = arith.constant 2 : index
    %61 = memref.load %arg2[%c2_46, %c2_47] : memref<3x4xf32, #tpu.memory_space<smem>>
    %c0_48 = arith.constant 0 : index
    %c2_49 = arith.constant 2 : index
    %c2_50 = arith.constant 2 : index
    %62 = vector.load %arg1[%c0_48, %c2_49, %c2_50] : memref<1x18x11xf32, #tpu.memory_space<vmem>>, vector<1x16x8xf32>
    %63 = vector.shape_cast %62 : vector<1x16x8xf32> to vector<16x8xf32>
    %64 = vector.broadcast %61 : f32 to vector<16x8xf32>
    %65 = arith.mulf %64, %63 : vector<16x8xf32>
    %66 = arith.addf %60, %65 : vector<16x8xf32>
    %c2_51 = arith.constant 2 : index
    %c3_52 = arith.constant 3 : index
    %67 = memref.load %arg2[%c2_51, %c3_52] : memref<3x4xf32, #tpu.memory_space<smem>>
    %c0_53 = arith.constant 0 : index
    %c2_54 = arith.constant 2 : index
    %c3_55 = arith.constant 3 : index
    %68 = vector.load %arg1[%c0_53, %c2_54, %c3_55] : memref<1x18x11xf32, #tpu.memory_space<vmem>>, vector<1x16x8xf32>
    %69 = vector.shape_cast %68 : vector<1x16x8xf32> to vector<16x8xf32>
    %70 = vector.broadcast %67 : f32 to vector<16x8xf32>
    %71 = arith.mulf %70, %69 : vector<16x8xf32>
    %72 = arith.addf %66, %71 : vector<16x8xf32>
    %c0_56 = arith.constant 0 : index
    %73 = memref.load %arg3[%c0_56] : memref<1xf32, #tpu.memory_space<smem>>
    %74 = vector.broadcast %73 : f32 to vector<16x8xf32>
    %75 = arith.addf %72, %74 : vector<16x8xf32>
    %cst_57 = arith.constant 0.000000e+00 : f32
    %76 = vector.broadcast %cst_57 : f32 to vector<16x8xf32>
    %77 = arith.cmpf oge, %75, %76 : vector<16x8xf32>
    %cst_58 = arith.constant 4.000000e-01 : f32
    %78 = vector.broadcast %cst_58 : f32 to vector<16x8xf32>
    %79 = arith.mulf %78, %75 : vector<16x8xf32>
    %80 = arith.select %77, %75, %79 : vector<16x8xi1>, vector<16x8xf32>
    %c0_59 = arith.constant 0 : index
    %c0_60 = arith.constant 0 : index
    %c0_61 = arith.constant 0 : index
    %81 = vector.load %arg4[%c0_59, %c0_60, %c0_61] : memref<1x16x8xf32, #tpu.memory_space<vmem>>, vector<1x16x8xf32>
    %82 = vector.shape_cast %81 : vector<1x16x8xf32> to vector<16x8xf32>
    %83 = vector.shape_cast %80 : vector<16x8xf32> to vector<1x16x8xf32>
    tpu.vector_store %arg4[%c0_59, %c0_60, %c0_61], %83 {strides = array<i32>} : memref<1x16x8xf32, #tpu.memory_space<vmem>>, vector<1x16x8xf32>,
    return
  }
  func.func @transform_0(%arg0: i32) -> (i32, i32, i32) {
    %c0_i32 = arith.constant 0 : i32
    %c0_i32_0 = arith.constant 0 : i32
    %c0_i32_1 = arith.constant 0 : i32
    return %arg0, %c0_i32, %c0_i32_0 : i32, i32, i32
  }
  func.func @transform_1(%arg0: i32) -> (i32, i32) {
    %c0_i32 = arith.constant 0 : i32
    %c0_i32_0 = arith.constant 0 : i32
    %c0_i32_1 = arith.constant 0 : i32
    return %c0_i32, %c0_i32_0 : i32, i32
  }
  func.func @transform_2(%arg0: i32) -> i32 {
    %c0_i32 = arith.constant 0 : i32
    %c0_i32_0 = arith.constant 0 : i32
    return %c0_i32 : i32
  }
  func.func @transform_3(%arg0: i32) -> (i32, i32, i32) {
    %c0_i32 = arith.constant 0 : i32
    %c0_i32_0 = arith.constant 0 : i32
    %c0_i32_1 = arith.constant 0 : i32
    return %arg0, %c0_i32, %c0_i32_0 : i32, i32, i32
  }
}

</mosaic_0001>

<bundles_post_ra>
// kernel: tpu_custom_call.1
= control target key start
LH: loop header
LB: loop body
LE: loop exit
PB: predicated region body
PF: predicated region fallthrough
CT: control target
= control target key end

     0   :  { %s584_s0 = inlined_call_operand.vmem [shape: f32[2,18,11], index: 0, kind: input, shape index: {}]   ;;  %s585_s1 = inlined_call_operand.vmem [shape: f32[3,4], index: 1, kind: input, shape index: {}]   ;;  %s586_s2 = inlined_call_operand.<no memory space> [shape: f32[1], index: 2, kind: input, shape index: {}]   ;;  %s587_s3 = inlined_call_operand.vmem [shape: f32[2,16,8], index: 3, kind: output, shape index: {}]  }
   0x1   :  { %8 = sst [smem:[#allocation2]] %s586_s2 }
   0x2   :  { %9 = vsyncpa [#allocation4], 0  ;;  %s517_s14 = smov 0  }
   0x3 LB: > { %s416_s15 = sadd.s32 4294967295, %s488_s14   ;;  %p418_p0 = scmp.ge.s32.totalorder %s488_s14, 1  ;;  %s488_s14 = sphi %s517_s14, %s15_s14  }
   0x4   : > { %p114_p1 = scmp.lt.s32.totalorder %s488_s14, 3  ;;  %s127_s18 = sshll.u32 %s585_s1, 4  ;;  %s128_s18 = int_to_ptr.vmem [resolvable:$true] %s127_s18 }
   0x5   : > { %p449_p3 = scmp.eq.s32.totalorder %s416_s15, 0  ;;  %s463_s19 = scalar_lea.vmem %s128_s18, 64 }
   0x6   : > { %p528_p2 = pnand %p418_p0, %p114_p1  ;;  %p464_p6 = scmp.ne.s32.totalorder %s128_s18, %s463_s19 }
   0x7   : > { %p471_p10 = scmp.lt.s32.totalorder %s128_s18, %s128_s18  ;;  %p472_p11 = scmp.lt.s32.totalorder %s463_s19, %s463_s19 }
   0x8   : > { %p445_p4 = pneg %p528_p2 }
   0x9   : > { %p473_p12 = por %p472_p11, %p471_p10 }
   0xa   : > { %p446_p5 = pnand %p449_p3, %p445_p4 }
   0xc   : > { %p465_p7 = pneg %p446_p5 }
   0xe   : > { %p466_p8 = pnand %p465_p7, %p464_p6 }
  0x10   : > { %p467_p9 = pneg %p466_p8 }
  0x12   : > { %p474_p13 = pnand %p473_p12, %p467_p9 }
  0x14   : > { %477 = shalt.err (!%p474_p13)
}
  0x15   : > { %s490_s20 = smov [#allocation3]   ;;  %151 = sbr.rel (%p528_p2) target bundleno = 196 (0xc4), region = 32 }
  0x16   : > { %448 = dma.vmem_to_smem (!%p446_p5), %s128_s18, 64, %s490_s20, [#allocation4]  }
  0x1c   : > { %483 = dma.done.wait (%p449_p3), [#allocation4], 64  }
  0x1d   : > { %485 = vsyncadd (%p449_p3), [#allocation4], 4294967232 }
  0x1e   : > { %157 = sfence }
  0x1f   : > { %p176_p0 = scmp.lt.s32.totalorder %s416_s15, 1  ;;  %s427_s21 = sld [smem:[#allocation3 + $0x2]]  ;;  %vm346_vm0 = vcmask 64512  }
  0x20   : > { %s426_s22 = sld [smem:[#allocation3 + $0x1]]  ;;  %s428_s23 = sld [smem:[#allocation3 + $0x3]] }
  0x21   : > { %s590_s15 = smov (!%p176_p0, %s416_s15), 1  ;;  %s430_s28 = sld [smem:[#allocation3 + $0x81]] }
  0x22   : > { %s440_s24 = smul.u32 24, %s590_s15  ;;  %s491_s29 = smov 126  }
  0x23   : > { %s492_s30 = smov 127   ;;  %s431_s4 = sld [smem:[#allocation3 + $0x82]] }
  0x24   : > { %s545_s27 = scalar_lea.vmem %s584_s0, %s440_s24  ;;  %s432_s5 = sld [smem:[#allocation3 + $0x83]] }
  0x25   : > { %v209_v0 = vstv %s427_s21  ;;  %v187_v1 = vld [vmem:[%s545_s27] sm:$0xff]  ;;  %v549_v2 = vld [vmem:[%s545_s27 + $0x8] sm:$0xff]  ;;  %s493_s6 = smov 125   ;;  %s434_s7 = sld [smem:[#allocation3 + $0x101]] }
  0x26   : > { %v195_v3 = vstv %s426_s22  ;;  %v210_v4 = vmul.f32 %v209_v0, %v187_v1  ;;  %v211_v6 = vmul.f32 %v209_v0, %v549_v2  ;;  %v223_v8 = vstv %s428_s23  ;;  %v238_v11 = vld [vmem:[%s545_s27 + $0x9] sm:$0xff]  ;;  %v237_v13 = vld [vmem:[%s545_s27 + $0x1] sm:$0xff]  ;;  %s435_s8 = sld [smem:[#allocation3 + $0x102]]  ;;  %s436_s9 = sld [smem:[#allocation3 + $0x103]] }
  0x27   : > { %v196_v5 = vmul.f32 %v195_v3, %v187_v1  ;;  %v197_v7 = vmul.f32 %v195_v3, %v549_v2  ;;  %v225_v9 = vmul.f32 %v223_v8, %v549_v2  ;;  %v224_v10 = vmul.f32 %v223_v8, %v187_v1  ;;  %v288_v22 = vld [vmem:[%s545_s27 + $0xa] sm:$0xff]  ;;  %v287_v24 = vld [vmem:[%s545_s27 + $0x2] sm:$0xff]  ;;  %s186_s10 = sld [smem:[#allocation3]]  ;;  %s439_s16 = sshll.u32 %s590_s15, 4 }
  0x28   : > { %214 = vrot.lane.b32.xlu1 %v210_v4, %s491_s29  ;;  %v245_v12 = vstv %s430_s28  ;;  %s429_s11 = sld [smem:[#allocation3 + $0x80]]  ;;  %s185_s2 = scalar_lea.vmem %s587_s3, %s439_s16 }
  0x29   : > { %200 = vrot.lane.b32.xlu0 %v196_v5, %s492_s30  ;;  %v247_v14 = vmul.f32 %v245_v12, %v238_v11  ;;  %v246_v15 = vmul.f32 %v245_v12, %v237_v13  ;;  %v259_v16 = vstv %s431_s4  ;;  %s433_s12 = sld [smem:[#allocation3 + $0x100]] }
  0x2a   : > { %v261_v17 = vmul.f32 %v259_v16, %v238_v11  ;;  %v260_v18 = vmul.f32 %v259_v16, %v237_v13  ;;  %v273_v19 = vstv %s432_s5  ;;  %s336_s13 = sld [smem:[#allocation2]] }
  0x2b   : > { %v275_v20 = vmul.f32 %v273_v19, %v238_v11  ;;  %v274_v21 = vmul.f32 %v273_v19, %v237_v13  ;;  %v295_v23 = vstv %s434_s7 }
  0x2c   : > { %216 = vrot.lane.b32.xlu1 %v211_v6, %s491_s29  ;;  %v297_v25 = vmul.f32 %v295_v23, %v288_v22  ;;  %v296_v26 = vmul.f32 %v295_v23, %v287_v24  ;;  %v309_v27 = vstv %s435_s8  ;;  %v323_v30 = vstv %s436_s9 }
  0x2d   : > { %202 = vrot.lane.b32.xlu0 %v197_v7, %s492_s30  ;;  %v311_v28 = vmul.f32 %v309_v27, %v288_v22  ;;  %v310_v29 = vmul.f32 %v309_v27, %v287_v24  ;;  %v325_v31 = vmul.f32 %v323_v30, %v288_v22  ;;  %v324_v32 = vmul.f32 %v323_v30, %v287_v24 }
  0x2e   : > { %v189_v33 = vstv %s186_s10  ;;  %v239_v41 = vstv %s429_s11 }
  0x2f   : > { %v190_v34 = vmul.f32 %v189_v33, %v187_v1  ;;  %v191_v37 = vmul.f32 %v189_v33, %v549_v2  ;;  %v241_v45 = vmul.f32 %v239_v41, %v238_v11  ;;  %v240_v46 = vmul.f32 %v239_v41, %v237_v13 }
  0x30   : > { %230 = vrot.lane.b32.xlu1 %v225_v9, %s493_s6  ;;  %v289_v57 = vstv %s433_s12 }
  0x31   : > { %228 = vrot.lane.b32.xlu0 %v224_v10, %s493_s6  ;;  %v291_v62 = vmul.f32 %v289_v57, %v288_v22  ;;  %v290_v63 = vmul.f32 %v289_v57, %v287_v24 }
  0x34   : > { %252 = vrot.lane.b32.xlu1 %v247_v14, %s492_s30  ;;  %v337_v14 = vstv %s336_s13 }
  0x35   : > { %250 = vrot.lane.b32.xlu0 %v246_v15, %s492_s30 }
  0x38   : > { %266 = vrot.lane.b32.xlu1 %v261_v17, %s491_s29 }
  0x39   : > { %264 = vrot.lane.b32.xlu0 %v260_v18, %s491_s29 }
  0x3c   : > { %280 = vrot.lane.b32.xlu1 %v275_v20, %s493_s6 }
  0x3d   : > { %278 = vrot.lane.b32.xlu0 %v274_v21, %s493_s6 }
  0x40   : > { %302 = vrot.lane.b32.xlu1 %v297_v25, %s492_s30 }
  0x41   : > { %300 = vrot.lane.b32.xlu0 %v296_v26, %s492_s30 }
  0x44   : > { %316 = vrot.lane.b32.xlu1 %v311_v28, %s491_s29 }
  0x45   : > { %314 = vrot.lane.b32.xlu0 %v310_v29, %s491_s29 }
  0x48   : > { %330 = vrot.lane.b32.xlu1 %v325_v31, %s493_s6 }
  0x49   : > { %328 = vrot.lane.b32.xlu0 %v324_v32, %s493_s6 }
  0x9a   : > { %v215_v35 = vpop.permute.xlu1 %214 }
  0x9b   : > { %v201_v36 = vpop.permute.xlu0 %200 }
  0x9c   : > { %v206_v38 = vadd.f32 %v201_v36, %v190_v34 }
  0x9e   : > { %v217_v39 = vpop.permute.xlu1 %216  ;;  %v220_v44 = vadd.f32 %v215_v35, %v206_v38 }
  0x9f   : > { %v203_v40 = vpop.permute.xlu0 %202 }
  0xa0   : > { %v207_v42 = vadd.f32 %v203_v40, %v191_v37 }
  0xa2   : > { %v221_v43 = vadd.f32 %v217_v39, %v207_v42  ;;  %v231_v47 = vpop.permute.xlu1 %230 }
  0xa3   : > { %v229_v48 = vpop.permute.xlu0 %228 }
  0xa4   : > { %v235_v49 = vadd.f32 %v231_v47, %v221_v43  ;;  %v234_v50 = vadd.f32 %v229_v48, %v220_v44 }
  0xa6   : > { %v243_v51 = vadd.f32 %v241_v45, %v235_v49  ;;  %v242_v52 = vadd.f32 %v240_v46, %v234_v50  ;;  %v253_v53 = vpop.permute.xlu1 %252 }
  0xa7   : > { %v251_v54 = vpop.permute.xlu0 %250 }
  0xa8   : > { %v257_v58 = vadd.f32 %v253_v53, %v243_v51  ;;  %v256_v59 = vadd.f32 %v251_v54, %v242_v52 }
  0xaa   : > { %v267_v55 = vpop.permute.xlu1 %266 }
  0xab   : > { %v265_v56 = vpop.permute.xlu0 %264  ;;  %v271_v60 = vadd.f32 %v267_v55, %v257_v58 }
  0xac   : > { %v270_v61 = vadd.f32 %v265_v56, %v256_v59 }
  0xae   : > { %v281_v0 = vpop.permute.xlu1 %280 }
  0xaf   : > { %v279_v1 = vpop.permute.xlu0 %278  ;;  %v285_v2 = vadd.f32 %v281_v0, %v271_v60 }
  0xb0   : > { %v284_v3 = vadd.f32 %v279_v1, %v270_v61 }
  0xb1   : > { %v293_v4 = vadd.f32 %v291_v62, %v285_v2 }
  0xb2   : > { %v292_v5 = vadd.f32 %v290_v63, %v284_v3  ;;  %v303_v6 = vpop.permute.xlu1 %302 }
  0xb3   : > { %v301_v7 = vpop.permute.xlu0 %300  ;;  %v307_v10 = vadd.f32 %v303_v6, %v293_v4 }
  0xb4   : > { %v306_v11 = vadd.f32 %v301_v7, %v292_v5 }
  0xb6   : > { %v317_v8 = vpop.permute.xlu1 %316 }
  0xb7   : > { %v315_v9 = vpop.permute.xlu0 %314  ;;  %v321_v12 = vadd.f32 %v317_v8, %v307_v10 }
  0xb8   : > { %v320_v13 = vadd.f32 %v315_v9, %v306_v11 }
  0xba   : > { %v331_v15 = vpop.permute.xlu1 %330 }
  0xbb   : > { %v329_v16 = vpop.permute.xlu0 %328  ;;  %v335_v17 = vadd.f32 %v331_v15, %v321_v12 }
  0xbc   : > { %v334_v18 = vadd.f32 %v329_v16, %v320_v13 }
  0xbd   : > { %v339_v19 = vadd.f32 %v337_v14, %v335_v17 }
  0xbe   : > { %v338_v20 = vadd.f32 %v337_v14, %v334_v18 }
  0xbf   : > { %vm341_vm1 = vcmp.ge.f32.partialorder %v339_v19, 0.0  ;;  %v343_v21 = vmul.f32 0.4, %v339_v19 }
  0xc0   : > { %vm340_vm2 = vcmp.ge.f32.partialorder %v338_v20, 0.0  ;;  %v342_v22 = vmul.f32 0.4, %v338_v20 }
  0xc1   : > { %v345_v23 = vsel %vm341_vm1, %v339_v19, %v343_v21 }
  0xc2   : > { %v344_v24 = vsel %vm340_vm2, %v338_v20, %v342_v22  ;;  %348 = vst.msk [vmem:[%s185_s2 + $0x8] sm:$0xff] %vm346_vm0, %v345_v23 }
  0xc3   : > { %347 = vst.msk [vmem:[%s185_s2] sm:$0xff] %vm346_vm0, %v344_v24 }
  0xc4 PF: > { %s15_s14 = sadd.s32 1, %s488_s14  }
  0xc5   : > { %p12_p1 = scmp.ge.s32.totalorder %s15_s14, 4  }
  0xc7   :  { %14 = sbr.rel (!%p12_p1) target bundleno = 3 (0x3), region = 67 }
  0xce   :  { %370 = vsyncpa [#allocation4], 1 }
  0xcf   :  { %372 = vsyncpa [#allocation4 + $0x1], 1 }

</bundles_post_ra>
